<compile_context>
chip_gen: v6e
topology: v6e:2x2x1
jax: 0.10.0
libtpu: 0.0.40
codegen_flags: <defaults>
</compile_context>

<pallas_src>
import jax
import jax.numpy as jnp
from jax import lax
from jax.experimental import pallas as pl
from jax.experimental.pallas import tpu as pltpu


def _linear_kernel(x_ref, w_ref, b_ref, o_ref):
    # x_ref: (TB, D), w_ref: (N_pad, D), b_ref: (1, N_pad), o_ref: (TB, N_pad)
    acc = lax.dot_general(
        x_ref[...], w_ref[...],
        dimension_numbers=(((1,), (1,)), ((), ())),   # contract on D  (x @ W^T)
        preferred_element_type=jnp.float32,
    )
    o_ref[...] = (acc + b_ref[...]).astype(o_ref.dtype)


def logreg_forward(x, weight, bias, size=(3, 32, 32)):
    """x: (B, C, H, W) float32; weight: (10, D); bias: (10,). Returns (B, 10)."""
    D = size[0] * size[1] * size[2]
    x_flat = x.reshape(-1, D).astype(jnp.float32)     # matches torch .view(-1, D)
    B = x_flat.shape[0]
    N = weight.shape[0]                               # 10

    # Pad the output dimension to a lane-dense 128 columns.
    N_PAD = 128
    w_pad = jnp.pad(weight.astype(jnp.float32), ((0, N_PAD - N), (0, 0)))
    b_pad = jnp.pad(bias.astype(jnp.float32), (0, N_PAD - N)).reshape(1, N_PAD)

    # Batch tiling: TB <= 512 rows keeps the double-buffered x tile well inside
    # the default scoped VMEM limit on every TPU generation (incl. v7x 64 MiB/TC).
    TB_MAX = 512
    if B <= TB_MAX:
        TB = max(8, ((B + 7) // 8) * 8)               # round up to 8 sublanes
        B_pad = TB
    else:
        TB = TB_MAX
        B_pad = ((B + TB - 1) // TB) * TB
    if B_pad != B:
        x_flat = jnp.pad(x_flat, ((0, B_pad - B), (0, 0)))

    grid = (B_pad // TB,)

    cost = pl.CostEstimate(
        flops=2 * B_pad * D * N_PAD,
        transcendentals=0,
        bytes_accessed=(B_pad * D + N_PAD * D + N_PAD + B_pad * N_PAD) * 4,
    )

    out = pl.pallas_call(
        _linear_kernel,
        out_shape=jax.ShapeDtypeStruct((B_pad, N_PAD), jnp.float32),
        grid_spec=pltpu.PrefetchScalarGridSpec(
            num_scalar_prefetch=0,
            grid=grid,
            in_specs=[
                pl.BlockSpec((TB, D), lambda i: (i, 0)),       # x: tiled on batch
                pl.BlockSpec((N_PAD, D), lambda i: (0, 0)),    # weight: VMEM-resident
                pl.BlockSpec((1, N_PAD), lambda i: (0, 0)),    # bias: VMEM-resident
            ],
            out_specs=pl.BlockSpec((TB, N_PAD), lambda i: (i, 0)),
        ),
        compiler_params=pltpu.CompilerParams(
            dimension_semantics=("parallel",),        # independent batch tiles
        ),
        cost_estimate=cost,
    )(x_flat, w_pad, b_pad)

    return out[:B, :N]


if __name__ == "__main__":
    size = (3, 32, 32)
    D = size[0] * size[1] * size[2]
    B = 2

    key = jax.random.PRNGKey(0)
    kx, kw, kb = jax.random.split(key, 3)

    # Deterministic synthetic parameters (shapes follow nn.Linear(D, 10)).
    x = jax.random.normal(kx, (B,) + size, dtype=jnp.float32)
    bound = 1.0 / (D ** 0.5)
    weight = jax.random.uniform(kw, (10, D), minval=-bound, maxval=bound,
                                dtype=jnp.float32)
    bias = jax.random.uniform(kb, (10,), minval=-bound, maxval=bound,
                              dtype=jnp.float32)

    out = logreg_forward(x, weight, bias, size=size)
    out = jax.block_until_ready(out)

    # Reference check in plain JAX.
    ref = x.reshape(-1, D) @ weight.T + bias
    assert out.shape == (B, 10)
    assert jnp.allclose(out, ref, atol=1e-4, rtol=1e-4)

    print("KERNEL_OK")
</pallas_src>

<mosaic_0001>
module attributes {stable_mosaic.version = 11 : i64} {
  func.func @_linear_kernel(%arg0: i32, %arg1: memref<8x3072xf32, #tpu.memory_space<vmem>>, %arg2: memref<128x3072xf32, #tpu.memory_space<vmem>>, %arg3: memref<1x128xf32, #tpu.memory_space<vmem>>, %arg4: memref<8x128xf32, #tpu.memory_space<vmem>>) attributes {dimension_semantics = [#tpu.dimension_semantics<parallel>], iteration_bounds = array<i64: 1>, scalar_prefetch = 0 : i64, scratch_operands = 0 : i64, tpu.core_type = #tpu.core_type<tc>, window_params = [{transform_indices = @transform_0, window_bounds = array<i64: 8, 3072>}, {pipeline_mode = #tpu.pipeline_mode<synchronous>, transform_indices = @transform_1, window_bounds = array<i64: 128, 3072>}, {pipeline_mode = #tpu.pipeline_mode<synchronous>, transform_indices = @transform_2, window_bounds = array<i64: 1, 128>}, {transform_indices = @transform_3, window_bounds = array<i64: 8, 128>}]} {
    %c0 = arith.constant 0 : index
    %c0_0 = arith.constant 0 : index
    %0 = vector.load %arg1[%c0, %c0_0] : memref<8x3072xf32, #tpu.memory_space<vmem>>, vector<8x3072xf32>
    %c0_1 = arith.constant 0 : index
    %c0_2 = arith.constant 0 : index
    %1 = vector.load %arg2[%c0_1, %c0_2] : memref<128x3072xf32, #tpu.memory_space<vmem>>, vector<128x3072xf32>
    %cst = arith.constant dense<0.000000e+00> : vector<8x128xf32>
    %2 = tpu.matmul %0, %1, %cst {dimension_numbers = #tpu.dot_dimension_numbers<[1], [1], [0], [0], [0, 0, 1, 0], [], []>} : vector<8x3072xf32>, vector<128x3072xf32>, vector<8x128xf32> -> vector<8x128xf32>
    %c0_3 = arith.constant 0 : index
    %c0_4 = arith.constant 0 : index
    %3 = vector.load %arg3[%c0_3, %c0_4] : memref<1x128xf32, #tpu.memory_space<vmem>>, vector<1x128xf32>
    %4 = vector.broadcast %3 : vector<1x128xf32> to vector<8x128xf32>
    %5 = arith.addf %2, %4 : vector<8x128xf32>
    %c0_5 = arith.constant 0 : index
    %c0_6 = arith.constant 0 : index
    %6 = vector.load %arg4[%c0_5, %c0_6] : memref<8x128xf32, #tpu.memory_space<vmem>>, vector<8x128xf32>
    tpu.vector_store %arg4[%c0_5, %c0_6], %5 {strides = array<i32>} : memref<8x128xf32, #tpu.memory_space<vmem>>, vector<8x128xf32>,
    return
  }
  func.func @transform_0(%arg0: i32) -> (i32, i32) {
    %c0_i32 = arith.constant 0 : i32
    %c0_i32_0 = arith.constant 0 : i32
    return %arg0, %c0_i32 : i32, i32
  }
  func.func @transform_1(%arg0: i32) -> (i32, i32) {
    %c0_i32 = arith.constant 0 : i32
    %c0_i32_0 = arith.constant 0 : i32
    %c0_i32_1 = arith.constant 0 : i32
    return %c0_i32, %c0_i32_0 : i32, i32
  }
  func.func @transform_2(%arg0: i32) -> (i32, i32) {
    %c0_i32 = arith.constant 0 : i32
    %c0_i32_0 = arith.constant 0 : i32
    %c0_i32_1 = arith.constant 0 : i32
    return %c0_i32, %c0_i32_0 : i32, i32
  }
  func.func @transform_3(%arg0: i32) -> (i32, i32) {
    %c0_i32 = arith.constant 0 : i32
    %c0_i32_0 = arith.constant 0 : i32
    return %arg0, %c0_i32 : i32, i32
  }
}

</mosaic_0001>

<bundles_post_ra>
// kernel: tpu_custom_call.1
= control target key start
LH: loop header
LB: loop body
LE: loop exit
PB: predicated region body
PF: predicated region fallthrough
CT: control target
= control target key end

     0   :  { %8 = vsyncpa [#allocation3], 0  ;;  %s1461_s0 = inlined_call_operand.hbm [shape: f32[8,3072], index: 0, kind: input, shape index: {}]   ;;  %s1462_s1 = inlined_call_operand.hbm [shape: f32[128,3072], index: 1, kind: input, shape index: {}]   ;;  %s1463_s2 = inlined_call_operand.hbm [shape: f32[1,128], index: 2, kind: input, shape index: {}]   ;;  %s1464_s3 = inlined_call_operand.hbm [shape: f32[8,128], index: 3, kind: output, shape index: {}]  }
   0x1   :  { %9 = vsyncpa [#allocation6], 0 }
   0x2   :  { %10 = vsyncpa [#allocation4], 0  ;;  %s1417_s12 = smov [#allocation5]  }
   0x3   :  { %s26_s13 = sshll.u32 %s1417_s12, 4  ;;  %s27_s13 = int_to_ptr.vmem [resolvable:$true] %s26_s13 }
   0x4   :  { %s1339_s14 = scalar_lea.vmem %s27_s13, 49152  ;;  %p1344_p1 = scmp.lt.s32.totalorder %s27_s13, %s27_s13 }
   0x5   :  { %p1340_p0 = scmp.ne.s32.totalorder %s27_s13, %s1339_s14  ;;  %p1345_p2 = scmp.lt.s32.totalorder %s1339_s14, %s1339_s14 }
   0x7   :  { %p1346_p3 = por %p1345_p2, %p1344_p1 }
   0x9   :  { %p1347_p4 = pnand %p1346_p3, %p1340_p0 }
   0xb   :  { %1350 = shalt.err (!%p1347_p4)
}
   0xc   :  { %s1418_s15 = smov 3072   ;;  %s1419_s16 = smov 192  }
   0xd   :  { %32 = dma.hbm_to_vmem [thread:$0]  %s1462_s1, 49152, %s27_s13, [#allocation6], %s1418_s15, %s1418_s15, %s1419_s16  }
   0xe   :  { %s1420_s19 = smov [#allocation2]   ;;  %s1421_s21 = smov [#allocation7]  }
   0xf   :  { %s17_s20 = sshll.u32 %s1420_s19, 4  ;;  %s39_s22 = sshll.u32 %s1421_s21, 4  ;;  %s18_s20 = int_to_ptr.vmem [resolvable:$true] %s17_s20  ;;  %s40_s22 = int_to_ptr.vmem [resolvable:$true] %s39_s22 }
  0x10   :  { %s1359_s23 = scalar_lea.vmem %s18_s20, 3072  ;;  %p1364_p6 = scmp.lt.s32.totalorder %s18_s20, %s18_s20 }
  0x11   :  { %p1360_p5 = scmp.ne.s32.totalorder %s18_s20, %s1359_s23  ;;  %p1365_p7 = scmp.lt.s32.totalorder %s1359_s23, %s1359_s23 }
  0x13   :  { %p1366_p8 = por %p1365_p7, %p1364_p6 }
  0x15   :  { %p1367_p9 = pnand %p1366_p8, %p1360_p5 }
  0x17   :  { %1370 = shalt.err (!%p1367_p9)
}
  0x18   :  { %20 = dma.hbm_to_vmem [thread:$0]  %s1461_s0, 3072, %s18_s20, [#allocation3]  }
  0x19   :  { %s1379_s26 = scalar_lea.vmem %s40_s22, 16  ;;  %s1383_s1 = scalar_lea.vmem %s40_s22, 32 }
  0x1a   :  { %p1380_p10 = scmp.ne.s32.totalorder %s40_s22, %s1379_s26  ;;  %p1384_p11 = scmp.lt.s32.totalorder %s40_s22, %s40_s22 }
  0x1b   :  { %p1385_p12 = scmp.lt.s32.totalorder %s1383_s1, %s1379_s26 }
  0x1d   :  { %p1386_p13 = por %p1385_p12, %p1384_p11 }
  0x1f   :  { %p1387_p0 = pnand %p1386_p13, %p1380_p10 }
  0x21   :  { %1390 = shalt.err (!%p1387_p0)
}
  0x22   :  { %42 = dma.hbm_to_vmem [thread:$0]  %s1463_s2, 16, %s40_s22, [#allocation6]  }
  0x23   :  { %1411 = dma.done.wait [#allocation3], 3072  }
  0x24   :  { %1412 = vsyncadd [#allocation3], 4294964224 }
  0x25   :  { %1413 = dma.done.wait [#allocation6], 49168  }
  0x26   :  { %1414 = vsyncadd [#allocation6], 4294918128  ;;  %v437_v0 = vld [vmem:[#allocation5 + $0xb48] sm:$0xff]  ;;  %v439_v1 = vld [vmem:[#allocation5 + $0xb58] sm:$0xff]  ;;  %s1422_s0 = smov [#allocation8]  }
  0x27   :  { %v436_v2 = vld [vmem:[#allocation5 + $0xb40] sm:$0xff]  ;;  %467 = vmatprep.subr.mxu0 %v437_v0  ;;  %537 = vmatprep.subr.mxu1 %v439_v1  ;;  %v438_v3 = vld [vmem:[#allocation5 + $0xb50] sm:$0xff]  ;;  %v413_v4 = vld [vmem:[#allocation5 + $0xa88] sm:$0xff]  ;;  %s1314_s2 = sshll.u32 %s1422_s0, 4  ;;  %s1315_s2 = int_to_ptr.vmem [resolvable:$true] %s1314_s2 }
  0x28   :  { %v415_v5 = vld [vmem:[#allocation5 + $0xa98] sm:$0xff]  ;;  %468 = vmatpush1.xpose.msra.mxu0 %v436_v2  ;;  %538 = vmatpush1.xpose.msra.mxu1 %v438_v3  ;;  %v412_v6 = vld [vmem:[#allocation5 + $0xa80] sm:$0xff]  ;;  %v414_v7 = vld [vmem:[#allocation5 + $0xa90] sm:$0xff]  ;;  %s1391_s29 = scalar_lea.vmem %s1315_s2, 128  ;;  %p1396_p2 = scmp.lt.s32.totalorder %s1315_s2, %s1315_s2 }
  0x29   :  { %469 = vmatprep.subr.mxu0 %v413_v4  ;;  %539 = vmatprep.subr.mxu1 %v415_v5  ;;  %v389_v8 = vld [vmem:[#allocation5 + $0x9c8] sm:$0xff]  ;;  %v391_v9 = vld [vmem:[#allocation5 + $0x9d8] sm:$0xff]  ;;  %v388_v10 = vld [vmem:[#allocation5 + $0x9c0] sm:$0xff]  ;;  %p1392_p1 = scmp.ne.s32.totalorder %s1315_s2, %s1391_s29  ;;  %p1397_p3 = scmp.lt.s32.totalorder %s1391_s29, %s1391_s29 }
  0x2a   :  { %v390_v11 = vld [vmem:[#allocation5 + $0x9d0] sm:$0xff]  ;;  %v365_v12 = vld [vmem:[#allocation5 + $0x908] sm:$0xff]  ;;  %v367_v13 = vld [vmem:[#allocation5 + $0x918] sm:$0xff] }
  0x2b   :  { %v364_v14 = vld [vmem:[#allocation5 + $0x900] sm:$0xff]  ;;  %v366_v15 = vld [vmem:[#allocation5 + $0x910] sm:$0xff]  ;;  %v341_v16 = vld [vmem:[#allocation5 + $0x848] sm:$0xff]  ;;  %p1398_p4 = por %p1397_p3, %p1396_p2 }
  0x2c   :  { %470 = vmatpush1.xpose.msra.mxu0 %v412_v6  ;;  %540 = vmatpush1.xpose.msra.mxu1 %v414_v7  ;;  %v343_v17 = vld [vmem:[#allocation5 + $0x858] sm:$0xff]  ;;  %v340_v18 = vld [vmem:[#allocation5 + $0x840] sm:$0xff]  ;;  %v342_v19 = vld [vmem:[#allocation5 + $0x850] sm:$0xff] }
  0x2d   :  { %471 = vmatprep.subr.mxu0 %v389_v8  ;;  %541 = vmatprep.subr.mxu1 %v391_v9  ;;  %v317_v20 = vld [vmem:[#allocation5 + $0x788] sm:$0xff]  ;;  %v319_v21 = vld [vmem:[#allocation5 + $0x798] sm:$0xff]  ;;  %v316_v22 = vld [vmem:[#allocation5 + $0x780] sm:$0xff]  ;;  %p1399_p5 = pnand %p1398_p4, %p1392_p1 }
  0x2e   :  { %v318_v23 = vld [vmem:[#allocation5 + $0x790] sm:$0xff]  ;;  %v293_v24 = vld [vmem:[#allocation5 + $0x6c8] sm:$0xff]  ;;  %v295_v25 = vld [vmem:[#allocation5 + $0x6d8] sm:$0xff] }
  0x2f   :  { %v53_v26 = vld [vmem:[#allocation2 + $0x8] sm:$0xff]  ;;  %v55_v27 = vld [vmem:[#allocation2 + $0x18] sm:$0xff]  ;;  %v292_v28 = vld [vmem:[#allocation5 + $0x6c0] sm:$0xff] }
  0x30   :  { %472 = vmatpush1.xpose.msra.mxu0 %v388_v10  ;;  %542 = vmatpush1.xpose.msra.mxu1 %v390_v11  ;;  %v294_v29 = vld [vmem:[#allocation5 + $0x6d0] sm:$0xff]  ;;  %v269_v30 = vld [vmem:[#allocation5 + $0x608] sm:$0xff]  ;;  %v271_v31 = vld [vmem:[#allocation5 + $0x618] sm:$0xff] }
  0x31   :  { %473 = vmatprep.subr.mxu0 %v365_v12  ;;  %543 = vmatprep.subr.mxu1 %v367_v13  ;;  %v268_v32 = vld [vmem:[#allocation5 + $0x600] sm:$0xff]  ;;  %v270_v33 = vld [vmem:[#allocation5 + $0x610] sm:$0xff]  ;;  %v245_v34 = vld [vmem:[#allocation5 + $0x548] sm:$0xff] }
  0x32   :  { %531 = vmatprep.mubr.f32.mxu0 %v53_v26  ;;  %601 = vmatprep.mubr.f32.mxu1 %v55_v27  ;;  %v247_v35 = vld [vmem:[#allocation5 + $0x558] sm:$0xff]  ;;  %v244_v36 = vld [vmem:[#allocation5 + $0x540] sm:$0xff]  ;;  %v246_v37 = vld [vmem:[#allocation5 + $0x550] sm:$0xff] }
  0x33   :  { %v221_v38 = vld [vmem:[#allocation5 + $0x488] sm:$0xff]  ;;  %v223_v39 = vld [vmem:[#allocation5 + $0x498] sm:$0xff]  ;;  %v220_v40 = vld [vmem:[#allocation5 + $0x480] sm:$0xff] }
  0x34   :  { %474 = vmatpush1.xpose.msra.mxu0 %v364_v14  ;;  %544 = vmatpush1.xpose.msra.mxu1 %v366_v15  ;;  %v222_v41 = vld [vmem:[#allocation5 + $0x490] sm:$0xff]  ;;  %v197_v42 = vld [vmem:[#allocation5 + $0x3c8] sm:$0xff]  ;;  %v199_v43 = vld [vmem:[#allocation5 + $0x3d8] sm:$0xff] }
  0x35   :  { %475 = vmatprep.subr.mxu0 %v341_v16  ;;  %545 = vmatprep.subr.mxu1 %v343_v17  ;;  %v196_v44 = vld [vmem:[#allocation5 + $0x3c0] sm:$0xff]  ;;  %v198_v45 = vld [vmem:[#allocation5 + $0x3d0] sm:$0xff]  ;;  %v173_v46 = vld [vmem:[#allocation5 + $0x308] sm:$0xff] }
  0x36   :  { %v175_v47 = vld [vmem:[#allocation5 + $0x318] sm:$0xff]  ;;  %v172_v48 = vld [vmem:[#allocation5 + $0x300] sm:$0xff]  ;;  %v174_v49 = vld [vmem:[#allocation5 + $0x310] sm:$0xff] }
  0x37   :  { %v149_v50 = vld [vmem:[#allocation5 + $0x248] sm:$0xff]  ;;  %v151_v51 = vld [vmem:[#allocation5 + $0x258] sm:$0xff]  ;;  %v148_v52 = vld [vmem:[#allocation5 + $0x240] sm:$0xff] }
  0x38   :  { %476 = vmatpush1.xpose.msra.mxu0 %v340_v18  ;;  %546 = vmatpush1.xpose.msra.mxu1 %v342_v19  ;;  %v150_v53 = vld [vmem:[#allocation5 + $0x250] sm:$0xff]  ;;  %v125_v54 = vld [vmem:[#allocation5 + $0x188] sm:$0xff]  ;;  %v127_v55 = vld [vmem:[#allocation5 + $0x198] sm:$0xff] }
  0x39   :  { %477 = vmatprep.subr.mxu0 %v317_v20  ;;  %547 = vmatprep.subr.mxu1 %v319_v21  ;;  %v124_v56 = vld [vmem:[#allocation5 + $0x180] sm:$0xff]  ;;  %v126_v57 = vld [vmem:[#allocation5 + $0x190] sm:$0xff]  ;;  %v101_v58 = vld [vmem:[#allocation5 + $0xc8] sm:$0xff] }
  0x3a   :  { %v103_v59 = vld [vmem:[#allocation5 + $0xd8] sm:$0xff]  ;;  %v100_v60 = vld [vmem:[#allocation5 + $0xc0] sm:$0xff]  ;;  %v102_v61 = vld [vmem:[#allocation5 + $0xd0] sm:$0xff] }
  0x3b   :  { %v77_v62 = vld [vmem:[#allocation5 + $0x8] sm:$0xff]  ;;  %v79_v63 = vld [vmem:[#allocation5 + $0x18] sm:$0xff]  ;;  %v76_v0 = vld [vmem:[#allocation5] sm:$0xff] }
  0x3c   :  { %478 = vmatpush1.xpose.msra.mxu0 %v316_v22  ;;  %548 = vmatpush1.xpose.msra.mxu1 %v318_v23  ;;  %v78_v1 = vld [vmem:[#allocation5 + $0x10] sm:$0xff]  ;;  %v441_v2 = vld [vmem:[#allocation5 + $0xb68] sm:$0xff]  ;;  %v443_v3 = vld [vmem:[#allocation5 + $0xb78] sm:$0xff] }
  0x3d   :  { %479 = vmatprep.subr.mxu0 %v293_v24  ;;  %549 = vmatprep.subr.mxu1 %v295_v25  ;;  %v52_v4 = vld [vmem:[#allocation2] sm:$0xff]  ;;  %v54_v5 = vld [vmem:[#allocation2 + $0x10] sm:$0xff]  ;;  %v417_v8 = vld [vmem:[#allocation5 + $0xaa8] sm:$0xff] }
  0x3e   :  { %v440_v6 = vld [vmem:[#allocation5 + $0xb60] sm:$0xff]  ;;  %v442_v7 = vld [vmem:[#allocation5 + $0xb70] sm:$0xff]  ;;  %v419_v9 = vld [vmem:[#allocation5 + $0xab8] sm:$0xff] }
  0x3f   :  { %v57_v10 = vld [vmem:[#allocation2 + $0x28] sm:$0xff]  ;;  %v59_v11 = vld [vmem:[#allocation2 + $0x38] sm:$0xff]  ;;  %v416_v12 = vld [vmem:[#allocation5 + $0xaa0] sm:$0xff] }
  0x40   :  { %480 = vmatpush1.xpose.msra.mxu0 %v292_v28  ;;  %550 = vmatpush1.xpose.msra.mxu1 %v294_v29  ;;  %v418_v13 = vld [vmem:[#allocation5 + $0xab0] sm:$0xff]  ;;  %v393_v14 = vld [vmem:[#allocation5 + $0x9e8] sm:$0xff]  ;;  %v395_v15 = vld [vmem:[#allocation5 + $0x9f8] sm:$0xff] }
  0x41   :  { %481 = vmatprep.subr.mxu0 %v269_v30  ;;  %551 = vmatprep.subr.mxu1 %v271_v31  ;;  %v392_v16 = vld [vmem:[#allocation5 + $0x9e0] sm:$0xff]  ;;  %v394_v17 = vld [vmem:[#allocation5 + $0x9f0] sm:$0xff]  ;;  %v369_v18 = vld [vmem:[#allocation5 + $0x928] sm:$0xff] }
  0x42   :  { %v371_v19 = vld [vmem:[#allocation5 + $0x938] sm:$0xff]  ;;  %v368_v20 = vld [vmem:[#allocation5 + $0x920] sm:$0xff]  ;;  %v370_v21 = vld [vmem:[#allocation5 + $0x930] sm:$0xff] }
  0x43   :  { %v345_v22 = vld [vmem:[#allocation5 + $0x868] sm:$0xff]  ;;  %v347_v23 = vld [vmem:[#allocation5 + $0x878] sm:$0xff]  ;;  %v344_v24 = vld [vmem:[#allocation5 + $0x860] sm:$0xff] }
  0x44   :  { %482 = vmatpush1.xpose.msra.mxu0 %v268_v32  ;;  %552 = vmatpush1.xpose.msra.mxu1 %v270_v33  ;;  %v346_v25 = vld [vmem:[#allocation5 + $0x870] sm:$0xff]  ;;  %v321_v26 = vld [vmem:[#allocation5 + $0x7a8] sm:$0xff]  ;;  %v323_v27 = vld [vmem:[#allocation5 + $0x7b8] sm:$0xff] }
  0x45   :  { %483 = vmatprep.subr.mxu0 %v245_v34  ;;  %553 = vmatprep.subr.mxu1 %v247_v35  ;;  %v320_v28 = vld [vmem:[#allocation5 + $0x7a0] sm:$0xff]  ;;  %v322_v29 = vld [vmem:[#allocation5 + $0x7b0] sm:$0xff]  ;;  %v297_v30 = vld [vmem:[#allocation5 + $0x6e8] sm:$0xff] }
  0x46   :  { %v299_v31 = vld [vmem:[#allocation5 + $0x6f8] sm:$0xff]  ;;  %v296_v32 = vld [vmem:[#allocation5 + $0x6e0] sm:$0xff]  ;;  %v298_v33 = vld [vmem:[#allocation5 + $0x6f0] sm:$0xff] }
  0x47   :  { %v273_v34 = vld [vmem:[#allocation5 + $0x628] sm:$0xff]  ;;  %v275_v35 = vld [vmem:[#allocation5 + $0x638] sm:$0xff] }
  0x48   :  { %484 = vmatpush1.xpose.msra.mxu0 %v244_v36  ;;  %554 = vmatpush1.xpose.msra.mxu1 %v246_v37  ;;  %v272_v36 = vld [vmem:[#allocation5 + $0x620] sm:$0xff]  ;;  %v274_v37 = vld [vmem:[#allocation5 + $0x630] sm:$0xff] }
  0x49   :  { %485 = vmatprep.subr.mxu0 %v221_v38  ;;  %555 = vmatprep.subr.mxu1 %v223_v39  ;;  %v249_v38 = vld [vmem:[#allocation5 + $0x568] sm:$0xff]  ;;  %v251_v39 = vld [vmem:[#allocation5 + $0x578] sm:$0xff] }
  0x4c   :  { %486 = vmatpush1.xpose.msra.mxu0 %v220_v40  ;;  %556 = vmatpush1.xpose.msra.mxu1 %v222_v41  ;;  %v248_v40 = vld [vmem:[#allocation5 + $0x560] sm:$0xff]  ;;  %v250_v41 = vld [vmem:[#allocation5 + $0x570] sm:$0xff] }
  0x4d   :  { %487 = vmatprep.subr.mxu0 %v197_v42  ;;  %557 = vmatprep.subr.mxu1 %v199_v43  ;;  %v225_v42 = vld [vmem:[#allocation5 + $0x4a8] sm:$0xff]  ;;  %v227_v43 = vld [vmem:[#allocation5 + $0x4b8] sm:$0xff] }
  0x50   :  { %488 = vmatpush1.xpose.msra.mxu0 %v196_v44  ;;  %558 = vmatpush1.xpose.msra.mxu1 %v198_v45  ;;  %v224_v44 = vld [vmem:[#allocation5 + $0x4a0] sm:$0xff]  ;;  %v226_v45 = vld [vmem:[#allocation5 + $0x4b0] sm:$0xff] }
  0x51   :  { %489 = vmatprep.subr.mxu0 %v173_v46  ;;  %559 = vmatprep.subr.mxu1 %v175_v47  ;;  %v201_v46 = vld [vmem:[#allocation5 + $0x3e8] sm:$0xff]  ;;  %v203_v47 = vld [vmem:[#allocation5 + $0x3f8] sm:$0xff] }
  0x54   :  { %490 = vmatpush1.xpose.msra.mxu0 %v172_v48  ;;  %560 = vmatpush1.xpose.msra.mxu1 %v174_v49  ;;  %v200_v48 = vld [vmem:[#allocation5 + $0x3e0] sm:$0xff]  ;;  %v202_v49 = vld [vmem:[#allocation5 + $0x3f0] sm:$0xff] }
  0x55   :  { %491 = vmatprep.subr.mxu0 %v149_v50  ;;  %561 = vmatprep.subr.mxu1 %v151_v51  ;;  %v177_v50 = vld [vmem:[#allocation5 + $0x328] sm:$0xff]  ;;  %v179_v51 = vld [vmem:[#allocation5 + $0x338] sm:$0xff] }
  0x58   :  { %492 = vmatpush1.xpose.msra.mxu0 %v148_v52  ;;  %562 = vmatpush1.xpose.msra.mxu1 %v150_v53  ;;  %v176_v52 = vld [vmem:[#allocation5 + $0x320] sm:$0xff]  ;;  %v178_v53 = vld [vmem:[#allocation5 + $0x330] sm:$0xff] }
  0x59   :  { %493 = vmatprep.subr.mxu0 %v125_v54  ;;  %563 = vmatprep.subr.mxu1 %v127_v55  ;;  %v153_v54 = vld [vmem:[#allocation5 + $0x268] sm:$0xff]  ;;  %v155_v55 = vld [vmem:[#allocation5 + $0x278] sm:$0xff] }
  0x5c   :  { %494 = vmatpush1.xpose.msra.mxu0 %v124_v56  ;;  %564 = vmatpush1.xpose.msra.mxu1 %v126_v57  ;;  %v152_v56 = vld [vmem:[#allocation5 + $0x260] sm:$0xff]  ;;  %v154_v57 = vld [vmem:[#allocation5 + $0x270] sm:$0xff] }
  0x5d   :  { %495 = vmatprep.subr.mxu0 %v101_v58  ;;  %565 = vmatprep.subr.mxu1 %v103_v59  ;;  %v129_v58 = vld [vmem:[#allocation5 + $0x1a8] sm:$0xff]  ;;  %v131_v59 = vld [vmem:[#allocation5 + $0x1b8] sm:$0xff] }
  0x60   :  { %496 = vmatpush1.xpose.msra.mxu0 %v100_v60  ;;  %566 = vmatpush1.xpose.msra.mxu1 %v102_v61  ;;  %v128_v60 = vld [vmem:[#allocation5 + $0x1a0] sm:$0xff]  ;;  %v130_v61 = vld [vmem:[#allocation5 + $0x1b0] sm:$0xff] }
  0x61   :  { %497 = vmatprep.subr.mxu0 %v77_v62  ;;  %567 = vmatprep.subr.mxu1 %v79_v63  ;;  %v105_v62 = vld [vmem:[#allocation5 + $0xe8] sm:$0xff]  ;;  %v107_v63 = vld [vmem:[#allocation5 + $0xf8] sm:$0xff] }
  0x64   :  { %498 = vmatpush1.xpose.msra.mxu0 %v76_v0  ;;  %568 = vmatpush1.xpose.msra.mxu1 %v78_v1  ;;  %v104_v0 = vld [vmem:[#allocation5 + $0xe0] sm:$0xff]  ;;  %v106_v1 = vld [vmem:[#allocation5 + $0xf0] sm:$0xff] }
  0x65   :  { %607 = vmatprep.subr.mxu0 %v441_v2  ;;  %677 = vmatprep.subr.mxu1 %v443_v3  ;;  %v81_v2 = vld [vmem:[#allocation5 + $0x28] sm:$0xff]  ;;  %v83_v3 = vld [vmem:[#allocation5 + $0x38] sm:$0xff] }
  0x67   :  { %532 = vmatmul.mubr.f32.vlgmr.msra.gmra.mxu0 %v52_v4  ;;  %602 = vmatmul.mubr.f32.vlgmr.msra.gmra.mxu1 %v54_v5  ;;  %v80_v4 = vld [vmem:[#allocation5 + $0x20] sm:$0xff]  ;;  %v82_v5 = vld [vmem:[#allocation5 + $0x30] sm:$0xff] }
  0x68   :  { %608 = vmatpush1.xpose.msra.mxu0 %v440_v6  ;;  %678 = vmatpush1.xpose.msra.mxu1 %v442_v7  ;;  %v445_v6 = vld [vmem:[#allocation5 + $0xb88] sm:$0xff]  ;;  %v447_v7 = vld [vmem:[#allocation5 + $0xb98] sm:$0xff] }
  0x69   :  { %609 = vmatprep.subr.mxu0 %v417_v8  ;;  %679 = vmatprep.subr.mxu1 %v419_v9  ;;  %v56_v8 = vld [vmem:[#allocation2 + $0x20] sm:$0xff]  ;;  %v58_v9 = vld [vmem:[#allocation2 + $0x30] sm:$0xff] }
  0x6a   :  { %671 = vmatprep.mubr.f32.mxu0 %v57_v10  ;;  %741 = vmatprep.mubr.f32.mxu1 %v59_v11  ;;  %v444_v10 = vld [vmem:[#allocation5 + $0xb80] sm:$0xff]  ;;  %v446_v11 = vld [vmem:[#allocation5 + $0xb90] sm:$0xff] }
  0x6c   :  { %610 = vmatpush1.xpose.msra.mxu0 %v416_v12  ;;  %680 = vmatpush1.xpose.msra.mxu1 %v418_v13  ;;  %v421_v12 = vld [vmem:[#allocation5 + $0xac8] sm:$0xff]  ;;  %v423_v13 = vld [vmem:[#allocation5 + $0xad8] sm:$0xff] }
  0x6d   :  { %611 = vmatprep.subr.mxu0 %v393_v14  ;;  %681 = vmatprep.subr.mxu1 %v395_v15  ;;  %v61_v14 = vld [vmem:[#allocation2 + $0x48] sm:$0xff]  ;;  %v63_v15 = vld [vmem:[#allocation2 + $0x58] sm:$0xff] }
  0x70   :  { %612 = vmatpush1.xpose.msra.mxu0 %v392_v16  ;;  %682 = vmatpush1.xpose.msra.mxu1 %v394_v17  ;;  %v420_v16 = vld [vmem:[#allocation5 + $0xac0] sm:$0xff]  ;;  %v422_v17 = vld [vmem:[#allocation5 + $0xad0] sm:$0xff] }
  0x71   :  { %613 = vmatprep.subr.mxu0 %v369_v18  ;;  %683 = vmatprep.subr.mxu1 %v371_v19  ;;  %v397_v18 = vld [vmem:[#allocation5 + $0xa08] sm:$0xff]  ;;  %v399_v19 = vld [vmem:[#allocation5 + $0xa18] sm:$0xff] }
  0x74   :  { %614 = vmatpush1.xpose.msra.mxu0 %v368_v20  ;;  %684 = vmatpush1.xpose.msra.mxu1 %v370_v21  ;;  %v396_v20 = vld [vmem:[#allocation5 + $0xa00] sm:$0xff]  ;;  %v398_v21 = vld [vmem:[#allocation5 + $0xa10] sm:$0xff] }
  0x75   :  { %615 = vmatprep.subr.mxu0 %v345_v22  ;;  %685 = vmatprep.subr.mxu1 %v347_v23  ;;  %v373_v22 = vld [vmem:[#allocation5 + $0x948] sm:$0xff]  ;;  %v375_v23 = vld [vmem:[#allocation5 + $0x958] sm:$0xff] }
  0x78   :  { %616 = vmatpush1.xpose.msra.mxu0 %v344_v24  ;;  %686 = vmatpush1.xpose.msra.mxu1 %v346_v25  ;;  %v372_v24 = vld [vmem:[#allocation5 + $0x940] sm:$0xff]  ;;  %v374_v25 = vld [vmem:[#allocation5 + $0x950] sm:$0xff] }
  0x79   :  { %617 = vmatprep.subr.mxu0 %v321_v26  ;;  %687 = vmatprep.subr.mxu1 %v323_v27  ;;  %v349_v26 = vld [vmem:[#allocation5 + $0x888] sm:$0xff]  ;;  %v351_v27 = vld [vmem:[#allocation5 + $0x898] sm:$0xff] }
  0x7c   :  { %618 = vmatpush1.xpose.msra.mxu0 %v320_v28  ;;  %688 = vmatpush1.xpose.msra.mxu1 %v322_v29  ;;  %v348_v28 = vld [vmem:[#allocation5 + $0x880] sm:$0xff]  ;;  %v350_v29 = vld [vmem:[#allocation5 + $0x890] sm:$0xff] }
  0x7d   :  { %619 = vmatprep.subr.mxu0 %v297_v30  ;;  %689 = vmatprep.subr.mxu1 %v299_v31  ;;  %v325_v30 = vld [vmem:[#allocation5 + $0x7c8] sm:$0xff]  ;;  %v327_v31 = vld [vmem:[#allocation5 + $0x7d8] sm:$0xff] }
  0x80   :  { %620 = vmatpush1.xpose.msra.mxu0 %v296_v32  ;;  %690 = vmatpush1.xpose.msra.mxu1 %v298_v33  ;;  %v324_v32 = vld [vmem:[#allocation5 + $0x7c0] sm:$0xff]  ;;  %v326_v33 = vld [vmem:[#allocation5 + $0x7d0] sm:$0xff] }
  0x81   :  { %621 = vmatprep.subr.mxu0 %v273_v34  ;;  %691 = vmatprep.subr.mxu1 %v275_v35  ;;  %v301_v34 = vld [vmem:[#allocation5 + $0x708] sm:$0xff]  ;;  %v303_v35 = vld [vmem:[#allocation5 + $0x718] sm:$0xff] }
  0x84   :  { %622 = vmatpush1.xpose.msra.mxu0 %v272_v36  ;;  %692 = vmatpush1.xpose.msra.mxu1 %v274_v37  ;;  %v300_v36 = vld [vmem:[#allocation5 + $0x700] sm:$0xff]  ;;  %v302_v37 = vld [vmem:[#allocation5 + $0x710] sm:$0xff] }
  0x85   :  { %623 = vmatprep.subr.mxu0 %v249_v38  ;;  %693 = vmatprep.subr.mxu1 %v251_v39  ;;  %v277_v38 = vld [vmem:[#allocation5 + $0x648] sm:$0xff]  ;;  %v279_v39 = vld [vmem:[#allocation5 + $0x658] sm:$0xff] }
  0x88   :  { %624 = vmatpush1.xpose.msra.mxu0 %v248_v40  ;;  %694 = vmatpush1.xpose.msra.mxu1 %v250_v41  ;;  %v276_v40 = vld [vmem:[#allocation5 + $0x640] sm:$0xff]  ;;  %v278_v41 = vld [vmem:[#allocation5 + $0x650] sm:$0xff] }
  0x89   :  { %625 = vmatprep.subr.mxu0 %v225_v42  ;;  %695 = vmatprep.subr.mxu1 %v227_v43  ;;  %v253_v42 = vld [vmem:[#allocation5 + $0x588] sm:$0xff]  ;;  %v255_v43 = vld [vmem:[#allocation5 + $0x598] sm:$0xff] }
  0x8c   :  { %626 = vmatpush1.xpose.msra.mxu0 %v224_v44  ;;  %696 = vmatpush1.xpose.msra.mxu1 %v226_v45  ;;  %v252_v44 = vld [vmem:[#allocation5 + $0x580] sm:$0xff]  ;;  %v254_v45 = vld [vmem:[#allocation5 + $0x590] sm:$0xff] }
  0x8d   :  { %627 = vmatprep.subr.mxu0 %v201_v46  ;;  %697 = vmatprep.subr.mxu1 %v203_v47  ;;  %v229_v46 = vld [vmem:[#allocation5 + $0x4c8] sm:$0xff]  ;;  %v231_v47 = vld [vmem:[#allocation5 + $0x4d8] sm:$0xff] }
  0x90   :  { %628 = vmatpush1.xpose.msra.mxu0 %v200_v48  ;;  %698 = vmatpush1.xpose.msra.mxu1 %v202_v49  ;;  %v228_v48 = vld [vmem:[#allocation5 + $0x4c0] sm:$0xff]  ;;  %v230_v49 = vld [vmem:[#allocation5 + $0x4d0] sm:$0xff] }
  0x91   :  { %629 = vmatprep.subr.mxu0 %v177_v50  ;;  %699 = vmatprep.subr.mxu1 %v179_v51  ;;  %v205_v50 = vld [vmem:[#allocation5 + $0x408] sm:$0xff]  ;;  %v207_v51 = vld [vmem:[#allocation5 + $0x418] sm:$0xff] }
  0x94   :  { %630 = vmatpush1.xpose.msra.mxu0 %v176_v52  ;;  %700 = vmatpush1.xpose.msra.mxu1 %v178_v53  ;;  %v204_v52 = vld [vmem:[#allocation5 + $0x400] sm:$0xff]  ;;  %v206_v53 = vld [vmem:[#allocation5 + $0x410] sm:$0xff] }
  0x95   :  { %631 = vmatprep.subr.mxu0 %v153_v54  ;;  %701 = vmatprep.subr.mxu1 %v155_v55  ;;  %v181_v54 = vld [vmem:[#allocation5 + $0x348] sm:$0xff]  ;;  %v183_v55 = vld [vmem:[#allocation5 + $0x358] sm:$0xff] }
  0x98   :  { %632 = vmatpush1.xpose.msra.mxu0 %v152_v56  ;;  %702 = vmatpush1.xpose.msra.mxu1 %v154_v57  ;;  %v180_v56 = vld [vmem:[#allocation5 + $0x340] sm:$0xff]  ;;  %v182_v57 = vld [vmem:[#allocation5 + $0x350] sm:$0xff] }
  0x99   :  { %633 = vmatprep.subr.mxu0 %v129_v58  ;;  %703 = vmatprep.subr.mxu1 %v131_v59  ;;  %v157_v58 = vld [vmem:[#allocation5 + $0x288] sm:$0xff]  ;;  %v159_v59 = vld [vmem:[#allocation5 + $0x298] sm:$0xff] }
  0x9c   :  { %634 = vmatpush1.xpose.msra.mxu0 %v128_v60  ;;  %704 = vmatpush1.xpose.msra.mxu1 %v130_v61  ;;  %v156_v60 = vld [vmem:[#allocation5 + $0x280] sm:$0xff]  ;;  %v158_v61 = vld [vmem:[#allocation5 + $0x290] sm:$0xff] }
  0x9d   :  { %635 = vmatprep.subr.mxu0 %v105_v62  ;;  %705 = vmatprep.subr.mxu1 %v107_v63  ;;  %v133_v62 = vld [vmem:[#allocation5 + $0x1c8] sm:$0xff]  ;;  %v135_v63 = vld [vmem:[#allocation5 + $0x1d8] sm:$0xff] }
  0xa0   :  { %636 = vmatpush1.xpose.msra.mxu0 %v104_v0  ;;  %706 = vmatpush1.xpose.msra.mxu1 %v106_v1  ;;  %v132_v0 = vld [vmem:[#allocation5 + $0x1c0] sm:$0xff]  ;;  %v134_v1 = vld [vmem:[#allocation5 + $0x1d0] sm:$0xff] }
  0xa1   :  { %637 = vmatprep.subr.mxu0 %v81_v2  ;;  %707 = vmatprep.subr.mxu1 %v83_v3  ;;  %v109_v2 = vld [vmem:[#allocation5 + $0x108] sm:$0xff]  ;;  %v111_v3 = vld [vmem:[#allocation5 + $0x118] sm:$0xff] }
  0xa4   :  { %638 = vmatpush1.xpose.msra.mxu0 %v80_v4  ;;  %708 = vmatpush1.xpose.msra.mxu1 %v82_v5  ;;  %v108_v4 = vld [vmem:[#allocation5 + $0x100] sm:$0xff]  ;;  %v110_v5 = vld [vmem:[#allocation5 + $0x110] sm:$0xff] }
  0xa5   :  { %747 = vmatprep.subr.mxu0 %v445_v6  ;;  %817 = vmatprep.subr.mxu1 %v447_v7  ;;  %v85_v6 = vld [vmem:[#allocation5 + $0x48] sm:$0xff]  ;;  %v87_v7 = vld [vmem:[#allocation5 + $0x58] sm:$0xff] }
  0xa7   :  { %672 = vmatmul.mubr.f32.vlgmr.msra.gmra.mxu0 %v56_v8  ;;  %742 = vmatmul.mubr.f32.vlgmr.msra.gmra.mxu1 %v58_v9  ;;  %v84_v8 = vld [vmem:[#allocation5 + $0x40] sm:$0xff]  ;;  %v86_v9 = vld [vmem:[#allocation5 + $0x50] sm:$0xff] }
  0xa8   :  { %748 = vmatpush1.xpose.msra.mxu0 %v444_v10  ;;  %818 = vmatpush1.xpose.msra.mxu1 %v446_v11  ;;  %v449_v10 = vld [vmem:[#allocation5 + $0xba8] sm:$0xff]  ;;  %v451_v11 = vld [vmem:[#allocation5 + $0xbb8] sm:$0xff] }
  0xa9   :  { %749 = vmatprep.subr.mxu0 %v421_v12  ;;  %819 = vmatprep.subr.mxu1 %v423_v13  ;;  %v60_v12 = vld [vmem:[#allocation2 + $0x40] sm:$0xff]  ;;  %v62_v13 = vld [vmem:[#allocation2 + $0x50] sm:$0xff] }
  0xaa   :  { %811 = vmatprep.mubr.f32.mxu0 %v61_v14  ;;  %881 = vmatprep.mubr.f32.mxu1 %v63_v15  ;;  %v448_v14 = vld [vmem:[#allocation5 + $0xba0] sm:$0xff]  ;;  %v450_v15 = vld [vmem:[#allocation5 + $0xbb0] sm:$0xff] }
  0xac   :  { %750 = vmatpush1.xpose.msra.mxu0 %v420_v16  ;;  %820 = vmatpush1.xpose.msra.mxu1 %v422_v17  ;;  %v425_v16 = vld [vmem:[#allocation5 + $0xae8] sm:$0xff]  ;;  %v427_v17 = vld [vmem:[#allocation5 + $0xaf8] sm:$0xff] }
  0xad   :  { %751 = vmatprep.subr.mxu0 %v397_v18  ;;  %821 = vmatprep.subr.mxu1 %v399_v19  ;;  %v65_v18 = vld [vmem:[#allocation2 + $0x68] sm:$0xff]  ;;  %v67_v19 = vld [vmem:[#allocation2 + $0x78] sm:$0xff] }
  0xb0   :  { %752 = vmatpush1.xpose.msra.mxu0 %v396_v20  ;;  %822 = vmatpush1.xpose.msra.mxu1 %v398_v21  ;;  %v424_v20 = vld [vmem:[#allocation5 + $0xae0] sm:$0xff]  ;;  %v426_v21 = vld [vmem:[#allocation5 + $0xaf0] sm:$0xff] }
  0xb1   :  { %753 = vmatprep.subr.mxu0 %v373_v22  ;;  %823 = vmatprep.subr.mxu1 %v375_v23  ;;  %v401_v22 = vld [vmem:[#allocation5 + $0xa28] sm:$0xff]  ;;  %v403_v23 = vld [vmem:[#allocation5 + $0xa38] sm:$0xff] }
  0xb4   :  { %754 = vmatpush1.xpose.msra.mxu0 %v372_v24  ;;  %824 = vmatpush1.xpose.msra.mxu1 %v374_v25  ;;  %v400_v24 = vld [vmem:[#allocation5 + $0xa20] sm:$0xff]  ;;  %v402_v25 = vld [vmem:[#allocation5 + $0xa30] sm:$0xff] }
  0xb5   :  { %755 = vmatprep.subr.mxu0 %v349_v26  ;;  %825 = vmatprep.subr.mxu1 %v351_v27  ;;  %v377_v26 = vld [vmem:[#allocation5 + $0x968] sm:$0xff]  ;;  %v379_v27 = vld [vmem:[#allocation5 + $0x978] sm:$0xff] }
  0xb8   :  { %756 = vmatpush1.xpose.msra.mxu0 %v348_v28  ;;  %826 = vmatpush1.xpose.msra.mxu1 %v350_v29  ;;  %v376_v28 = vld [vmem:[#allocation5 + $0x960] sm:$0xff]  ;;  %v378_v29 = vld [vmem:[#allocation5 + $0x970] sm:$0xff] }
  0xb9   :  { %757 = vmatprep.subr.mxu0 %v325_v30  ;;  %827 = vmatprep.subr.mxu1 %v327_v31  ;;  %v353_v30 = vld [vmem:[#allocation5 + $0x8a8] sm:$0xff]  ;;  %v355_v31 = vld [vmem:[#allocation5 + $0x8b8] sm:$0xff] }
  0xbc   :  { %758 = vmatpush1.xpose.msra.mxu0 %v324_v32  ;;  %828 = vmatpush1.xpose.msra.mxu1 %v326_v33  ;;  %v352_v32 = vld [vmem:[#allocation5 + $0x8a0] sm:$0xff]  ;;  %v354_v33 = vld [vmem:[#allocation5 + $0x8b0] sm:$0xff] }
  0xbd   :  { %759 = vmatprep.subr.mxu0 %v301_v34  ;;  %829 = vmatprep.subr.mxu1 %v303_v35  ;;  %v329_v34 = vld [vmem:[#allocation5 + $0x7e8] sm:$0xff]  ;;  %v331_v35 = vld [vmem:[#allocation5 + $0x7f8] sm:$0xff] }
  0xc0   :  { %760 = vmatpush1.xpose.msra.mxu0 %v300_v36  ;;  %830 = vmatpush1.xpose.msra.mxu1 %v302_v37  ;;  %v328_v36 = vld [vmem:[#allocation5 + $0x7e0] sm:$0xff]  ;;  %v330_v37 = vld [vmem:[#allocation5 + $0x7f0] sm:$0xff] }
  0xc1   :  { %761 = vmatprep.subr.mxu0 %v277_v38  ;;  %831 = vmatprep.subr.mxu1 %v279_v39  ;;  %v305_v38 = vld [vmem:[#allocation5 + $0x728] sm:$0xff]  ;;  %v307_v39 = vld [vmem:[#allocation5 + $0x738] sm:$0xff] }
  0xc4   :  { %762 = vmatpush1.xpose.msra.mxu0 %v276_v40  ;;  %832 = vmatpush1.xpose.msra.mxu1 %v278_v41  ;;  %v304_v40 = vld [vmem:[#allocation5 + $0x720] sm:$0xff]  ;;  %v306_v41 = vld [vmem:[#allocation5 + $0x730] sm:$0xff] }
  0xc5   :  { %763 = vmatprep.subr.mxu0 %v253_v42  ;;  %833 = vmatprep.subr.mxu1 %v255_v43  ;;  %v281_v42 = vld [vmem:[#allocation5 + $0x668] sm:$0xff]  ;;  %v283_v43 = vld [vmem:[#allocation5 + $0x678] sm:$0xff] }
  0xc8   :  { %764 = vmatpush1.xpose.msra.mxu0 %v252_v44  ;;  %834 = vmatpush1.xpose.msra.mxu1 %v254_v45  ;;  %v280_v44 = vld [vmem:[#allocation5 + $0x660] sm:$0xff]  ;;  %v282_v45 = vld [vmem:[#allocation5 + $0x670] sm:$0xff] }
  0xc9   :  { %765 = vmatprep.subr.mxu0 %v229_v46  ;;  %835 = vmatprep.subr.mxu1 %v231_v47  ;;  %v257_v46 = vld [vmem:[#allocation5 + $0x5a8] sm:$0xff]  ;;  %v259_v47 = vld [vmem:[#allocation5 + $0x5b8] sm:$0xff] }
  0xcc   :  { %766 = vmatpush1.xpose.msra.mxu0 %v228_v48  ;;  %836 = vmatpush1.xpose.msra.mxu1 %v230_v49  ;;  %v256_v48 = vld [vmem:[#allocation5 + $0x5a0] sm:$0xff]  ;;  %v258_v49 = vld [vmem:[#allocation5 + $0x5b0] sm:$0xff] }
  0xcd   :  { %767 = vmatprep.subr.mxu0 %v205_v50  ;;  %837 = vmatprep.subr.mxu1 %v207_v51  ;;  %v233_v50 = vld [vmem:[#allocation5 + $0x4e8] sm:$0xff]  ;;  %v235_v51 = vld [vmem:[#allocation5 + $0x4f8] sm:$0xff] }
  0xd0   :  { %768 = vmatpush1.xpose.msra.mxu0 %v204_v52  ;;  %838 = vmatpush1.xpose.msra.mxu1 %v206_v53  ;;  %v232_v52 = vld [vmem:[#allocation5 + $0x4e0] sm:$0xff]  ;;  %v234_v53 = vld [vmem:[#allocation5 + $0x4f0] sm:$0xff] }
  0xd1   :  { %769 = vmatprep.subr.mxu0 %v181_v54  ;;  %839 = vmatprep.subr.mxu1 %v183_v55  ;;  %v209_v54 = vld [vmem:[#allocation5 + $0x428] sm:$0xff]  ;;  %v211_v55 = vld [vmem:[#allocation5 + $0x438] sm:$0xff] }
  0xd4   :  { %770 = vmatpush1.xpose.msra.mxu0 %v180_v56  ;;  %840 = vmatpush1.xpose.msra.mxu1 %v182_v57  ;;  %v208_v56 = vld [vmem:[#allocation5 + $0x420] sm:$0xff]  ;;  %v210_v57 = vld [vmem:[#allocation5 + $0x430] sm:$0xff] }
  0xd5   :  { %771 = vmatprep.subr.mxu0 %v157_v58  ;;  %841 = vmatprep.subr.mxu1 %v159_v59  ;;  %v185_v58 = vld [vmem:[#allocation5 + $0x368] sm:$0xff]  ;;  %v187_v59 = vld [vmem:[#allocation5 + $0x378] sm:$0xff] }
  0xd8   :  { %772 = vmatpush1.xpose.msra.mxu0 %v156_v60  ;;  %842 = vmatpush1.xpose.msra.mxu1 %v158_v61  ;;  %v184_v60 = vld [vmem:[#allocation5 + $0x360] sm:$0xff]  ;;  %v186_v61 = vld [vmem:[#allocation5 + $0x370] sm:$0xff] }
  0xd9   :  { %773 = vmatprep.subr.mxu0 %v133_v62  ;;  %843 = vmatprep.subr.mxu1 %v135_v63  ;;  %v161_v62 = vld [vmem:[#allocation5 + $0x2a8] sm:$0xff]  ;;  %v163_v63 = vld [vmem:[#allocation5 + $0x2b8] sm:$0xff] }
  0xdc   :  { %774 = vmatpush1.xpose.msra.mxu0 %v132_v0  ;;  %844 = vmatpush1.xpose.msra.mxu1 %v134_v1  ;;  %v160_v0 = vld [vmem:[#allocation5 + $0x2a0] sm:$0xff]  ;;  %v162_v1 = vld [vmem:[#allocation5 + $0x2b0] sm:$0xff] }
  0xdd   :  { %775 = vmatprep.subr.mxu0 %v109_v2  ;;  %845 = vmatprep.subr.mxu1 %v111_v3  ;;  %v137_v2 = vld [vmem:[#allocation5 + $0x1e8] sm:$0xff]  ;;  %v139_v3 = vld [vmem:[#allocation5 + $0x1f8] sm:$0xff] }
  0xe0   :  { %776 = vmatpush1.xpose.msra.mxu0 %v108_v4  ;;  %846 = vmatpush1.xpose.msra.mxu1 %v110_v5  ;;  %v136_v4 = vld [vmem:[#allocation5 + $0x1e0] sm:$0xff]  ;;  %v138_v5 = vld [vmem:[#allocation5 + $0x1f0] sm:$0xff] }
  0xe1   :  { %777 = vmatprep.subr.mxu0 %v85_v6  ;;  %847 = vmatprep.subr.mxu1 %v87_v7  ;;  %v113_v6 = vld [vmem:[#allocation5 + $0x128] sm:$0xff]  ;;  %v115_v7 = vld [vmem:[#allocation5 + $0x138] sm:$0xff] }
  0xe4   :  { %778 = vmatpush1.xpose.msra.mxu0 %v84_v8  ;;  %848 = vmatpush1.xpose.msra.mxu1 %v86_v9  ;;  %v112_v8 = vld [vmem:[#allocation5 + $0x120] sm:$0xff]  ;;  %v114_v9 = vld [vmem:[#allocation5 + $0x130] sm:$0xff] }
  0xe5   :  { %887 = vmatprep.subr.mxu0 %v449_v10  ;;  %957 = vmatprep.subr.mxu1 %v451_v11  ;;  %v89_v10 = vld [vmem:[#allocation5 + $0x68] sm:$0xff]  ;;  %v91_v11 = vld [vmem:[#allocation5 + $0x78] sm:$0xff] }
  0xe7   :  { %812 = vmatmul.mubr.f32.vlgmr.msra.gmra.mxu0 %v60_v12  ;;  %882 = vmatmul.mubr.f32.vlgmr.msra.gmra.mxu1 %v62_v13  ;;  %v88_v12 = vld [vmem:[#allocation5 + $0x60] sm:$0xff]  ;;  %v90_v13 = vld [vmem:[#allocation5 + $0x70] sm:$0xff] }
  0xe8   :  { %888 = vmatpush1.xpose.msra.mxu0 %v448_v14  ;;  %958 = vmatpush1.xpose.msra.mxu1 %v450_v15  ;;  %v453_v14 = vld [vmem:[#allocation5 + $0xbc8] sm:$0xff]  ;;  %v455_v15 = vld [vmem:[#allocation5 + $0xbd8] sm:$0xff] }
  0xe9   :  { %889 = vmatprep.subr.mxu0 %v425_v16  ;;  %959 = vmatprep.subr.mxu1 %v427_v17  ;;  %v64_v16 = vld [vmem:[#allocation2 + $0x60] sm:$0xff]  ;;  %v66_v17 = vld [vmem:[#allocation2 + $0x70] sm:$0xff] }
  0xea   :  { %951 = vmatprep.mubr.f32.mxu0 %v65_v18  ;;  %1021 = vmatprep.mubr.f32.mxu1 %v67_v19  ;;  %v1324_v18 = vld [vmem:[#allocation7] ss:$0 sm:$0xff] }
  0xeb   :  { %v452_v19 = vld [vmem:[#allocation5 + $0xbc0] sm:$0xff] }
  0xec   :  { %890 = vmatpush1.xpose.msra.mxu0 %v424_v20  ;;  %960 = vmatpush1.xpose.msra.mxu1 %v426_v21  ;;  %v454_v20 = vld [vmem:[#allocation5 + $0xbd0] sm:$0xff]  ;;  %v429_v21 = vld [vmem:[#allocation5 + $0xb08] sm:$0xff] }
  0xed   :  { %891 = vmatprep.subr.mxu0 %v401_v22  ;;  %961 = vmatprep.subr.mxu1 %v403_v23  ;;  %v431_v22 = vld [vmem:[#allocation5 + $0xb18] sm:$0xff] }
  0xf0   :  { %892 = vmatpush1.xpose.msra.mxu0 %v400_v24  ;;  %962 = vmatpush1.xpose.msra.mxu1 %v402_v25  ;;  %v69_v25 = vld [vmem:[#allocation2 + $0x88] sm:$0xff] }
  0xf1   :  { %893 = vmatprep.subr.mxu0 %v377_v26  ;;  %963 = vmatprep.subr.mxu1 %v379_v27  ;;  %v71_v26 = vld [vmem:[#allocation2 + $0x98] sm:$0xff] }
  0xf4   :  { %894 = vmatpush1.xpose.msra.mxu0 %v376_v28  ;;  %964 = vmatpush1.xpose.msra.mxu1 %v378_v29 }
  0xf5   :  { %895 = vmatprep.subr.mxu0 %v353_v30  ;;  %965 = vmatprep.subr.mxu1 %v355_v31  ;;  %v428_v30 = vld [vmem:[#allocation5 + $0xb00] sm:$0xff]  ;;  %v430_v31 = vld [vmem:[#allocation5 + $0xb10] sm:$0xff] }
  0xf8   :  { %896 = vmatpush1.xpose.msra.mxu0 %v352_v32  ;;  %966 = vmatpush1.xpose.msra.mxu1 %v354_v33  ;;  %v405_v33 = vld [vmem:[#allocation5 + $0xa48] sm:$0xff] }
  0xf9   :  { %897 = vmatprep.subr.mxu0 %v329_v34  ;;  %967 = vmatprep.subr.mxu1 %v331_v35  ;;  %v407_v34 = vld [vmem:[#allocation5 + $0xa58] sm:$0xff]  ;;  %v404_v35 = vld [vmem:[#allocation5 + $0xa40] sm:$0xff] }
  0xfc   :  { %898 = vmatpush1.xpose.msra.mxu0 %v328_v36  ;;  %968 = vmatpush1.xpose.msra.mxu1 %v330_v37  ;;  %v406_v36 = vld [vmem:[#allocation5 + $0xa50] sm:$0xff]  ;;  %v381_v37 = vld [vmem:[#allocation5 + $0x988] sm:$0xff] }
  0xfd   :  { %899 = vmatprep.subr.mxu0 %v305_v38  ;;  %969 = vmatprep.subr.mxu1 %v307_v39  ;;  %v383_v38 = vld [vmem:[#allocation5 + $0x998] sm:$0xff]  ;;  %v380_v39 = vld [vmem:[#allocation5 + $0x980] sm:$0xff] }
 0x100   :  { %900 = vmatpush1.xpose.msra.mxu0 %v304_v40  ;;  %970 = vmatpush1.xpose.msra.mxu1 %v306_v41  ;;  %v382_v40 = vld [vmem:[#allocation5 + $0x990] sm:$0xff]  ;;  %v357_v41 = vld [vmem:[#allocation5 + $0x8c8] sm:$0xff] }
 0x101   :  { %901 = vmatprep.subr.mxu0 %v281_v42  ;;  %971 = vmatprep.subr.mxu1 %v283_v43  ;;  %v359_v42 = vld [vmem:[#allocation5 + $0x8d8] sm:$0xff]  ;;  %v356_v43 = vld [vmem:[#allocation5 + $0x8c0] sm:$0xff] }
 0x104   :  { %902 = vmatpush1.xpose.msra.mxu0 %v280_v44  ;;  %972 = vmatpush1.xpose.msra.mxu1 %v282_v45  ;;  %v358_v44 = vld [vmem:[#allocation5 + $0x8d0] sm:$0xff]  ;;  %v333_v45 = vld [vmem:[#allocation5 + $0x808] sm:$0xff] }
 0x105   :  { %903 = vmatprep.subr.mxu0 %v257_v46  ;;  %973 = vmatprep.subr.mxu1 %v259_v47  ;;  %v335_v46 = vld [vmem:[#allocation5 + $0x818] sm:$0xff]  ;;  %v332_v47 = vld [vmem:[#allocation5 + $0x800] sm:$0xff] }
 0x108   :  { %904 = vmatpush1.xpose.msra.mxu0 %v256_v48  ;;  %974 = vmatpush1.xpose.msra.mxu1 %v258_v49  ;;  %v334_v48 = vld [vmem:[#allocation5 + $0x810] sm:$0xff]  ;;  %v309_v49 = vld [vmem:[#allocation5 + $0x748] sm:$0xff] }
 0x109   :  { %905 = vmatprep.subr.mxu0 %v233_v50  ;;  %975 = vmatprep.subr.mxu1 %v235_v51  ;;  %v311_v50 = vld [vmem:[#allocation5 + $0x758] sm:$0xff]  ;;  %v308_v51 = vld [vmem:[#allocation5 + $0x740] sm:$0xff] }
 0x10c   :  { %906 = vmatpush1.xpose.msra.mxu0 %v232_v52  ;;  %976 = vmatpush1.xpose.msra.mxu1 %v234_v53  ;;  %v310_v52 = vld [vmem:[#allocation5 + $0x750] sm:$0xff]  ;;  %v285_v53 = vld [vmem:[#allocation5 + $0x688] sm:$0xff] }
 0x10d   :  { %907 = vmatprep.subr.mxu0 %v209_v54  ;;  %977 = vmatprep.subr.mxu1 %v211_v55  ;;  %v287_v54 = vld [vmem:[#allocation5 + $0x698] sm:$0xff]  ;;  %v284_v55 = vld [vmem:[#allocation5 + $0x680] sm:$0xff] }
 0x110   :  { %908 = vmatpush1.xpose.msra.mxu0 %v208_v56  ;;  %978 = vmatpush1.xpose.msra.mxu1 %v210_v57  ;;  %v286_v56 = vld [vmem:[#allocation5 + $0x690] sm:$0xff]  ;;  %v261_v57 = vld [vmem:[#allocation5 + $0x5c8] sm:$0xff] }
 0x111   :  { %909 = vmatprep.subr.mxu0 %v185_v58  ;;  %979 = vmatprep.subr.mxu1 %v187_v59  ;;  %v263_v58 = vld [vmem:[#allocation5 + $0x5d8] sm:$0xff]  ;;  %v260_v59 = vld [vmem:[#allocation5 + $0x5c0] sm:$0xff] }
 0x114   :  { %910 = vmatpush1.xpose.msra.mxu0 %v184_v60  ;;  %980 = vmatpush1.xpose.msra.mxu1 %v186_v61  ;;  %v262_v60 = vld [vmem:[#allocation5 + $0x5d0] sm:$0xff]  ;;  %v237_v61 = vld [vmem:[#allocation5 + $0x508] sm:$0xff] }
 0x115   :  { %911 = vmatprep.subr.mxu0 %v161_v62  ;;  %981 = vmatprep.subr.mxu1 %v163_v63  ;;  %v239_v62 = vld [vmem:[#allocation5 + $0x518] sm:$0xff]  ;;  %v236_v63 = vld [vmem:[#allocation5 + $0x500] sm:$0xff] }
 0x118   :  { %912 = vmatpush1.xpose.msra.mxu0 %v160_v0  ;;  %982 = vmatpush1.xpose.msra.mxu1 %v162_v1  ;;  %v238_v0 = vld [vmem:[#allocation5 + $0x510] sm:$0xff]  ;;  %v213_v1 = vld [vmem:[#allocation5 + $0x448] sm:$0xff] }
 0x119   :  { %913 = vmatprep.subr.mxu0 %v137_v2  ;;  %983 = vmatprep.subr.mxu1 %v139_v3  ;;  %v215_v2 = vld [vmem:[#allocation5 + $0x458] sm:$0xff]  ;;  %v212_v3 = vld [vmem:[#allocation5 + $0x440] sm:$0xff] }
 0x11c   :  { %914 = vmatpush1.xpose.msra.mxu0 %v136_v4  ;;  %984 = vmatpush1.xpose.msra.mxu1 %v138_v5  ;;  %v214_v4 = vld [vmem:[#allocation5 + $0x450] sm:$0xff]  ;;  %v189_v5 = vld [vmem:[#allocation5 + $0x388] sm:$0xff] }
 0x11d   :  { %915 = vmatprep.subr.mxu0 %v113_v6  ;;  %985 = vmatprep.subr.mxu1 %v115_v7  ;;  %v191_v6 = vld [vmem:[#allocation5 + $0x398] sm:$0xff]  ;;  %v188_v7 = vld [vmem:[#allocation5 + $0x380] sm:$0xff] }
 0x120   :  { %916 = vmatpush1.xpose.msra.mxu0 %v112_v8  ;;  %986 = vmatpush1.xpose.msra.mxu1 %v114_v9  ;;  %v190_v8 = vld [vmem:[#allocation5 + $0x390] sm:$0xff]  ;;  %v165_v9 = vld [vmem:[#allocation5 + $0x2c8] sm:$0xff] }
 0x121   :  { %917 = vmatprep.subr.mxu0 %v89_v10  ;;  %987 = vmatprep.subr.mxu1 %v91_v11  ;;  %v167_v10 = vld [vmem:[#allocation5 + $0x2d8] sm:$0xff]  ;;  %v164_v11 = vld [vmem:[#allocation5 + $0x2c0] sm:$0xff] }
 0x124   :  { %918 = vmatpush1.xpose.msra.mxu0 %v88_v12  ;;  %988 = vmatpush1.xpose.msra.mxu1 %v90_v13  ;;  %v166_v12 = vld [vmem:[#allocation5 + $0x2d0] sm:$0xff]  ;;  %v141_v13 = vld [vmem:[#allocation5 + $0x208] sm:$0xff] }
 0x125   :  { %1027 = vmatprep.subr.mxu0 %v453_v14  ;;  %1097 = vmatprep.subr.mxu1 %v455_v15  ;;  %v143_v14 = vld [vmem:[#allocation5 + $0x218] sm:$0xff]  ;;  %v140_v15 = vld [vmem:[#allocation5 + $0x200] sm:$0xff] }
 0x127   :  { %v533_v23 = vpop.f32.mrf.mxu0  ;;  %952 = vmatmul.mubr.f32.vlgmr.msra.gmra.mxu0 %v64_v16  ;;  %v603_v24 = vpop.f32.mrf.mxu1  ;;  %1022 = vmatmul.mubr.f32.vlgmr.msra.gmra.mxu1 %v66_v17  ;;  %v142_v16 = vld [vmem:[#allocation5 + $0x210] sm:$0xff]  ;;  %v117_v17 = vld [vmem:[#allocation5 + $0x148] sm:$0xff] }
 0x128   :  { %v534_v27 = vadd.f32 %v1324_v18, %v533_v23  ;;  %1028 = vmatpush1.xpose.msra.mxu0 %v452_v19  ;;  %1098 = vmatpush1.xpose.msra.mxu1 %v454_v20  ;;  %v119_v18 = vld [vmem:[#allocation5 + $0x158] sm:$0xff]  ;;  %v116_v19 = vld [vmem:[#allocation5 + $0x140] sm:$0xff]  ;;  %v118_v20 = vld [vmem:[#allocation5 + $0x150] sm:$0xff] }
 0x129   :  { %v535_v28 = vpop.f32.mrf.mxu0  ;;  %v605_v29 = vpop.f32.mrf.mxu1  ;;  %1029 = vmatprep.subr.mxu0 %v429_v21  ;;  %1099 = vmatprep.subr.mxu1 %v431_v22  ;;  %v93_v21 = vld [vmem:[#allocation5 + $0x88] sm:$0xff]  ;;  %v95_v22 = vld [vmem:[#allocation5 + $0x98] sm:$0xff]  ;;  %v92_v23 = vld [vmem:[#allocation5 + $0x80] sm:$0xff] }
 0x12a   :  { %v1452_v32 = vadd.f32 %v603_v24, %v534_v27  ;;  %1091 = vmatprep.mubr.f32.mxu0 %v69_v25  ;;  %1161 = vmatprep.mubr.f32.mxu1 %v71_v26  ;;  %v94_v24 = vld [vmem:[#allocation5 + $0x90] sm:$0xff]  ;;  %v457_v25 = vld [vmem:[#allocation5 + $0xbe8] sm:$0xff]  ;;  %v459_v26 = vld [vmem:[#allocation5 + $0xbf8] sm:$0xff] }
 0x12b   :  { %v68_v27 = vld [vmem:[#allocation2 + $0x80] sm:$0xff]  ;;  %v70_v28 = vld [vmem:[#allocation2 + $0x90] sm:$0xff] }
 0x12c   :  { %1030 = vmatpush1.xpose.msra.mxu0 %v428_v30  ;;  %1100 = vmatpush1.xpose.msra.mxu1 %v430_v31  ;;  %v456_v29 = vld [vmem:[#allocation5 + $0xbe0] sm:$0xff]  ;;  %v458_v30 = vld [vmem:[#allocation5 + $0xbf0] sm:$0xff]  ;;  %v433_v31 = vld [vmem:[#allocation5 + $0xb28] sm:$0xff] }
 0x12d   :  { %1031 = vmatprep.subr.mxu0 %v405_v33  ;;  %1101 = vmatprep.subr.mxu1 %v407_v34  ;;  %v435_v33 = vld [vmem:[#allocation5 + $0xb38] sm:$0xff] }
 0x130   :  { %1032 = vmatpush1.xpose.msra.mxu0 %v404_v35  ;;  %1102 = vmatpush1.xpose.msra.mxu1 %v406_v36  ;;  %v73_v36 = vld [vmem:[#allocation2 + $0xa8] sm:$0xff] }
 0x131   :  { %1033 = vmatprep.subr.mxu0 %v381_v37  ;;  %1103 = vmatprep.subr.mxu1 %v383_v38  ;;  %v75_v37 = vld [vmem:[#allocation2 + $0xb8] sm:$0xff] }
 0x134   :  { %1034 = vmatpush1.xpose.msra.mxu0 %v380_v39  ;;  %1104 = vmatpush1.xpose.msra.mxu1 %v382_v40 }
 0x135   :  { %1035 = vmatprep.subr.mxu0 %v357_v41  ;;  %1105 = vmatprep.subr.mxu1 %v359_v42  ;;  %v432_v41 = vld [vmem:[#allocation5 + $0xb20] sm:$0xff]  ;;  %v434_v42 = vld [vmem:[#allocation5 + $0xb30] sm:$0xff] }
 0x138   :  { %1036 = vmatpush1.xpose.msra.mxu0 %v356_v43  ;;  %1106 = vmatpush1.xpose.msra.mxu1 %v358_v44  ;;  %v409_v44 = vld [vmem:[#allocation5 + $0xa68] sm:$0xff] }
 0x139   :  { %1037 = vmatprep.subr.mxu0 %v333_v45  ;;  %1107 = vmatprep.subr.mxu1 %v335_v46  ;;  %v411_v45 = vld [vmem:[#allocation5 + $0xa78] sm:$0xff]  ;;  %v408_v46 = vld [vmem:[#allocation5 + $0xa60] sm:$0xff] }
 0x13c   :  { %1038 = vmatpush1.xpose.msra.mxu0 %v332_v47  ;;  %1108 = vmatpush1.xpose.msra.mxu1 %v334_v48  ;;  %v385_v47 = vld [vmem:[#allocation5 + $0x9a8] sm:$0xff]  ;;  %v387_v48 = vld [vmem:[#allocation5 + $0x9b8] sm:$0xff] }
 0x13d   :  { %1039 = vmatprep.subr.mxu0 %v309_v49  ;;  %1109 = vmatprep.subr.mxu1 %v311_v50  ;;  %v384_v49 = vld [vmem:[#allocation5 + $0x9a0] sm:$0xff]  ;;  %v386_v50 = vld [vmem:[#allocation5 + $0x9b0] sm:$0xff] }
 0x140   :  { %1040 = vmatpush1.xpose.msra.mxu0 %v308_v51  ;;  %1110 = vmatpush1.xpose.msra.mxu1 %v310_v52  ;;  %v361_v51 = vld [vmem:[#allocation5 + $0x8e8] sm:$0xff]  ;;  %v363_v52 = vld [vmem:[#allocation5 + $0x8f8] sm:$0xff] }
 0x141   :  { %1041 = vmatprep.subr.mxu0 %v285_v53  ;;  %1111 = vmatprep.subr.mxu1 %v287_v54  ;;  %v360_v53 = vld [vmem:[#allocation5 + $0x8e0] sm:$0xff]  ;;  %v362_v54 = vld [vmem:[#allocation5 + $0x8f0] sm:$0xff] }
 0x144   :  { %1042 = vmatpush1.xpose.msra.mxu0 %v284_v55  ;;  %1112 = vmatpush1.xpose.msra.mxu1 %v286_v56  ;;  %v337_v55 = vld [vmem:[#allocation5 + $0x828] sm:$0xff]  ;;  %v339_v56 = vld [vmem:[#allocation5 + $0x838] sm:$0xff] }
 0x145   :  { %1043 = vmatprep.subr.mxu0 %v261_v57  ;;  %1113 = vmatprep.subr.mxu1 %v263_v58  ;;  %v336_v57 = vld [vmem:[#allocation5 + $0x820] sm:$0xff]  ;;  %v338_v58 = vld [vmem:[#allocation5 + $0x830] sm:$0xff] }
 0x148   :  { %1044 = vmatpush1.xpose.msra.mxu0 %v260_v59  ;;  %1114 = vmatpush1.xpose.msra.mxu1 %v262_v60  ;;  %v313_v59 = vld [vmem:[#allocation5 + $0x768] sm:$0xff]  ;;  %v315_v60 = vld [vmem:[#allocation5 + $0x778] sm:$0xff] }
 0x149   :  { %1045 = vmatprep.subr.mxu0 %v237_v61  ;;  %1115 = vmatprep.subr.mxu1 %v239_v62  ;;  %v312_v61 = vld [vmem:[#allocation5 + $0x760] sm:$0xff]  ;;  %v314_v62 = vld [vmem:[#allocation5 + $0x770] sm:$0xff] }
 0x14c   :  { %1046 = vmatpush1.xpose.msra.mxu0 %v236_v63  ;;  %1116 = vmatpush1.xpose.msra.mxu1 %v238_v0  ;;  %v289_v63 = vld [vmem:[#allocation5 + $0x6a8] sm:$0xff]  ;;  %v291_v0 = vld [vmem:[#allocation5 + $0x6b8] sm:$0xff] }
 0x14d   :  { %1047 = vmatprep.subr.mxu0 %v213_v1  ;;  %1117 = vmatprep.subr.mxu1 %v215_v2  ;;  %v288_v1 = vld [vmem:[#allocation5 + $0x6a0] sm:$0xff]  ;;  %v290_v2 = vld [vmem:[#allocation5 + $0x6b0] sm:$0xff] }
 0x150   :  { %1048 = vmatpush1.xpose.msra.mxu0 %v212_v3  ;;  %1118 = vmatpush1.xpose.msra.mxu1 %v214_v4  ;;  %v265_v3 = vld [vmem:[#allocation5 + $0x5e8] sm:$0xff]  ;;  %v267_v4 = vld [vmem:[#allocation5 + $0x5f8] sm:$0xff] }
 0x151   :  { %1049 = vmatprep.subr.mxu0 %v189_v5  ;;  %1119 = vmatprep.subr.mxu1 %v191_v6  ;;  %v264_v5 = vld [vmem:[#allocation5 + $0x5e0] sm:$0xff]  ;;  %v266_v6 = vld [vmem:[#allocation5 + $0x5f0] sm:$0xff] }
 0x154   :  { %1050 = vmatpush1.xpose.msra.mxu0 %v188_v7  ;;  %1120 = vmatpush1.xpose.msra.mxu1 %v190_v8  ;;  %v241_v7 = vld [vmem:[#allocation5 + $0x528] sm:$0xff]  ;;  %v243_v8 = vld [vmem:[#allocation5 + $0x538] sm:$0xff] }
 0x155   :  { %1051 = vmatprep.subr.mxu0 %v165_v9  ;;  %1121 = vmatprep.subr.mxu1 %v167_v10  ;;  %v240_v9 = vld [vmem:[#allocation5 + $0x520] sm:$0xff]  ;;  %v242_v10 = vld [vmem:[#allocation5 + $0x530] sm:$0xff] }
 0x158   :  { %1052 = vmatpush1.xpose.msra.mxu0 %v164_v11  ;;  %1122 = vmatpush1.xpose.msra.mxu1 %v166_v12  ;;  %v217_v11 = vld [vmem:[#allocation5 + $0x468] sm:$0xff]  ;;  %v219_v12 = vld [vmem:[#allocation5 + $0x478] sm:$0xff] }
 0x159   :  { %1053 = vmatprep.subr.mxu0 %v141_v13  ;;  %1123 = vmatprep.subr.mxu1 %v143_v14  ;;  %v216_v13 = vld [vmem:[#allocation5 + $0x460] sm:$0xff]  ;;  %v218_v14 = vld [vmem:[#allocation5 + $0x470] sm:$0xff] }
 0x15c   :  { %1054 = vmatpush1.xpose.msra.mxu0 %v140_v15  ;;  %1124 = vmatpush1.xpose.msra.mxu1 %v142_v16  ;;  %v193_v15 = vld [vmem:[#allocation5 + $0x3a8] sm:$0xff]  ;;  %v195_v16 = vld [vmem:[#allocation5 + $0x3b8] sm:$0xff] }
 0x15d   :  { %1055 = vmatprep.subr.mxu0 %v117_v17  ;;  %1125 = vmatprep.subr.mxu1 %v119_v18  ;;  %v192_v17 = vld [vmem:[#allocation5 + $0x3a0] sm:$0xff]  ;;  %v194_v18 = vld [vmem:[#allocation5 + $0x3b0] sm:$0xff] }
 0x160   :  { %1056 = vmatpush1.xpose.msra.mxu0 %v116_v19  ;;  %1126 = vmatpush1.xpose.msra.mxu1 %v118_v20  ;;  %v169_v19 = vld [vmem:[#allocation5 + $0x2e8] sm:$0xff]  ;;  %v171_v20 = vld [vmem:[#allocation5 + $0x2f8] sm:$0xff] }
 0x161   :  { %1057 = vmatprep.subr.mxu0 %v93_v21  ;;  %1127 = vmatprep.subr.mxu1 %v95_v22  ;;  %v168_v21 = vld [vmem:[#allocation5 + $0x2e0] sm:$0xff]  ;;  %v170_v22 = vld [vmem:[#allocation5 + $0x2f0] sm:$0xff] }
 0x164   :  { %1058 = vmatpush1.xpose.msra.mxu0 %v92_v23  ;;  %1128 = vmatpush1.xpose.msra.mxu1 %v94_v24  ;;  %v145_v23 = vld [vmem:[#allocation5 + $0x228] sm:$0xff]  ;;  %v147_v24 = vld [vmem:[#allocation5 + $0x238] sm:$0xff] }
 0x165   :  { %1167 = vmatprep.subr.mxu0 %v457_v25  ;;  %1237 = vmatprep.subr.mxu1 %v459_v26  ;;  %v144_v25 = vld [vmem:[#allocation5 + $0x220] sm:$0xff]  ;;  %v146_v26 = vld [vmem:[#allocation5 + $0x230] sm:$0xff] }
 0x167   :  { %v673_v34 = vpop.f32.mrf.mxu0  ;;  %1092 = vmatmul.mubr.f32.vlgmr.msra.gmra.mxu0 %v68_v27  ;;  %v743_v35 = vpop.f32.mrf.mxu1  ;;  %1162 = vmatmul.mubr.f32.vlgmr.msra.gmra.mxu1 %v70_v28  ;;  %v121_v27 = vld [vmem:[#allocation5 + $0x168] sm:$0xff]  ;;  %v123_v28 = vld [vmem:[#allocation5 + $0x178] sm:$0xff] }
 0x168   :  { %v674_v38 = vadd.f32 %v673_v34, %v1452_v32  ;;  %1168 = vmatpush1.xpose.msra.mxu0 %v456_v29  ;;  %1238 = vmatpush1.xpose.msra.mxu1 %v458_v30  ;;  %v410_v32 = vld [vmem:[#allocation5 + $0xa70] sm:$0xff]  ;;  %v120_v29 = vld [vmem:[#allocation5 + $0x160] sm:$0xff] }
 0x169   :  { %v675_v39 = vpop.f32.mrf.mxu0  ;;  %v745_v40 = vpop.f32.mrf.mxu1  ;;  %1169 = vmatprep.subr.mxu0 %v433_v31  ;;  %1239 = vmatprep.subr.mxu1 %v435_v33  ;;  %v122_v30 = vld [vmem:[#allocation5 + $0x170] sm:$0xff]  ;;  %v97_v31 = vld [vmem:[#allocation5 + $0xa8] sm:$0xff]  ;;  %v99_v33 = vld [vmem:[#allocation5 + $0xb8] sm:$0xff] }
 0x16a   :  { %v1455_v43 = vadd.f32 %v743_v35, %v674_v38  ;;  %1231 = vmatprep.mubr.f32.mxu0 %v73_v36  ;;  %1301 = vmatprep.mubr.f32.mxu1 %v75_v37  ;;  %v96_v34 = vld [vmem:[#allocation5 + $0xa0] sm:$0xff]  ;;  %v98_v35 = vld [vmem:[#allocation5 + $0xb0] sm:$0xff] }
 0x16b   :  { %v72_v36 = vld [vmem:[#allocation2 + $0xa0] sm:$0xff]  ;;  %v74_v37 = vld [vmem:[#allocation2 + $0xb0] sm:$0xff] }
 0x16c   :  { %1170 = vmatpush1.xpose.msra.mxu0 %v432_v41  ;;  %1240 = vmatpush1.xpose.msra.mxu1 %v434_v42 }
 0x16d   :  { %1171 = vmatprep.subr.mxu0 %v409_v44  ;;  %1241 = vmatprep.subr.mxu1 %v411_v45 }
 0x170   :  { %1172 = vmatpush1.xpose.msra.mxu0 %v408_v46  ;;  %1242 = vmatpush1.xpose.msra.mxu1 %v410_v32 }
 0x171   :  { %1173 = vmatprep.subr.mxu0 %v385_v47  ;;  %1243 = vmatprep.subr.mxu1 %v387_v48 }
 0x174   :  { %1174 = vmatpush1.xpose.msra.mxu0 %v384_v49  ;;  %1244 = vmatpush1.xpose.msra.mxu1 %v386_v50 }
 0x175   :  { %1175 = vmatprep.subr.mxu0 %v361_v51  ;;  %1245 = vmatprep.subr.mxu1 %v363_v52 }
 0x178   :  { %1176 = vmatpush1.xpose.msra.mxu0 %v360_v53  ;;  %1246 = vmatpush1.xpose.msra.mxu1 %v362_v54 }
 0x179   :  { %1177 = vmatprep.subr.mxu0 %v337_v55  ;;  %1247 = vmatprep.subr.mxu1 %v339_v56 }
 0x17c   :  { %1178 = vmatpush1.xpose.msra.mxu0 %v336_v57  ;;  %1248 = vmatpush1.xpose.msra.mxu1 %v338_v58 }
 0x17d   :  { %1179 = vmatprep.subr.mxu0 %v313_v59  ;;  %1249 = vmatprep.subr.mxu1 %v315_v60 }
 0x180   :  { %1180 = vmatpush1.xpose.msra.mxu0 %v312_v61  ;;  %1250 = vmatpush1.xpose.msra.mxu1 %v314_v62 }
 0x181   :  { %1181 = vmatprep.subr.mxu0 %v289_v63  ;;  %1251 = vmatprep.subr.mxu1 %v291_v0 }
 0x184   :  { %1182 = vmatpush1.xpose.msra.mxu0 %v288_v1  ;;  %1252 = vmatpush1.xpose.msra.mxu1 %v290_v2 }
 0x185   :  { %1183 = vmatprep.subr.mxu0 %v265_v3  ;;  %1253 = vmatprep.subr.mxu1 %v267_v4 }
 0x188   :  { %1184 = vmatpush1.xpose.msra.mxu0 %v264_v5  ;;  %1254 = vmatpush1.xpose.msra.mxu1 %v266_v6 }
 0x189   :  { %1185 = vmatprep.subr.mxu0 %v241_v7  ;;  %1255 = vmatprep.subr.mxu1 %v243_v8 }
 0x18c   :  { %1186 = vmatpush1.xpose.msra.mxu0 %v240_v9  ;;  %1256 = vmatpush1.xpose.msra.mxu1 %v242_v10 }
 0x18d   :  { %1187 = vmatprep.subr.mxu0 %v217_v11  ;;  %1257 = vmatprep.subr.mxu1 %v219_v12 }
 0x190   :  { %1188 = vmatpush1.xpose.msra.mxu0 %v216_v13  ;;  %1258 = vmatpush1.xpose.msra.mxu1 %v218_v14 }
 0x191   :  { %1189 = vmatprep.subr.mxu0 %v193_v15  ;;  %1259 = vmatprep.subr.mxu1 %v195_v16 }
 0x194   :  { %1190 = vmatpush1.xpose.msra.mxu0 %v192_v17  ;;  %1260 = vmatpush1.xpose.msra.mxu1 %v194_v18 }
 0x195   :  { %1191 = vmatprep.subr.mxu0 %v169_v19  ;;  %1261 = vmatprep.subr.mxu1 %v171_v20 }
 0x198   :  { %1192 = vmatpush1.xpose.msra.mxu0 %v168_v21  ;;  %1262 = vmatpush1.xpose.msra.mxu1 %v170_v22 }
 0x199   :  { %1193 = vmatprep.subr.mxu0 %v145_v23  ;;  %1263 = vmatprep.subr.mxu1 %v147_v24 }
 0x19c   :  { %1194 = vmatpush1.xpose.msra.mxu0 %v144_v25  ;;  %1264 = vmatpush1.xpose.msra.mxu1 %v146_v26 }
 0x19d   :  { %1195 = vmatprep.subr.mxu0 %v121_v27  ;;  %1265 = vmatprep.subr.mxu1 %v123_v28 }
 0x1a0   :  { %1196 = vmatpush1.xpose.msra.mxu0 %v120_v29  ;;  %1266 = vmatpush1.xpose.msra.mxu1 %v122_v30 }
 0x1a1   :  { %1197 = vmatprep.subr.mxu0 %v97_v31  ;;  %1267 = vmatprep.subr.mxu1 %v99_v33 }
 0x1a4   :  { %1198 = vmatpush1.xpose.msra.mxu0 %v96_v34  ;;  %1268 = vmatpush1.xpose.msra.mxu1 %v98_v35 }
 0x1a7   :  { %v813_v38 = vpop.f32.mrf.mxu0  ;;  %1232 = vmatmul.mubr.f32.vlgmr.msra.gmra.mxu0 %v72_v36  ;;  %1302 = vmatmul.mubr.f32.vlgmr.msra.gmra.mxu1 %v74_v37  ;;  %v883_v39 = vpop.f32.mrf.mxu1 }
 0x1a8   :  { %v814_v40 = vadd.f32 %v813_v38, %v1455_v43 }
 0x1a9   :  { %v815_v41 = vpop.f32.mrf.mxu0  ;;  %v885_v42 = vpop.f32.mrf.mxu1 }
 0x1aa   :  { %v884_v44 = vadd.f32 %v883_v39, %v814_v40 }
 0x1e7   :  { %v953_v45 = vpop.f32.mrf.mxu0  ;;  %v1023_v46 = vpop.f32.mrf.mxu1 }
 0x1e8   :  { %v954_v32 = vadd.f32 %v953_v45, %v884_v44 }
 0x1e9   :  { %v955_v47 = vpop.f32.mrf.mxu0  ;;  %v1025_v48 = vpop.f32.mrf.mxu1 }
 0x1ea   :  { %v1024_v49 = vadd.f32 %v1023_v46, %v954_v32 }
 0x227   :  { %v1093_v50 = vpop.f32.mrf.mxu0  ;;  %v1163_v51 = vpop.f32.mrf.mxu1 }
 0x228   :  { %v1094_v54 = vadd.f32 %v1093_v50, %v1024_v49 }
 0x229   :  { %v1095_v52 = vpop.f32.mrf.mxu0  ;;  %v1165_v53 = vpop.f32.mrf.mxu1 }
 0x22a   :  { %v1164_v55 = vadd.f32 %v1163_v51, %v1094_v54 }
 0x267   :  { %v1233_v56 = vpop.f32.mrf.mxu0  ;;  %v1303_v57 = vpop.f32.mrf.mxu1 }
 0x268   :  { %v1234_v43 = vadd.f32 %v1233_v56, %v1164_v55 }
 0x269   :  { %v1235_v58 = vpop.f32.mrf.mxu0  ;;  %v1305_v59 = vpop.f32.mrf.mxu1 }
 0x26a   :  { %v1304_v60 = vadd.f32 %v1303_v57, %v1234_v43 }
 0x26c   :  { %1307 = vst [vmem:[#allocation8] sm:$0xff] %v1304_v60 }
 0x26d   :  { %1402 = shalt.err (!%p1399_p5)
}
 0x26e   :  { %1317 = dma.vmem_to_hbm [thread:$0]  %s1315_s2, 128, %s1464_s3, [#allocation4]  }
 0x26f   :  { %1415 = dma.done.wait [#allocation4], 128  }
 0x270   :  { %1416 = vsyncadd [#allocation4], 4294967168 }
 0x271   :  { %1321 = vsyncpa [#allocation3], 1 }
 0x272   :  { %1322 = vsyncpa [#allocation6], 1 }
 0x273   :  { %1323 = vsyncpa [#allocation4], 1 }

</bundles_post_ra>
